<compile_context>
chip_gen: v6e
topology: v6e:2x2x1
jax: 0.10.0
libtpu: 0.0.40
codegen_flags: <defaults>
</compile_context>

<pallas_src>
import jax
import jax.numpy as jnp
from jax.experimental import pallas as pl
from jax.experimental.pallas import tpu as pltpu


_LANE = 128          # TPU lane width; batch tiles are multiples of this
_MAX_TILE = 32768    # keeps double-buffered VMEM ~34 MiB (v7x physical = 64 MiB)


def _round_up(n, m):
    return ((n + m - 1) // m) * m


def _slp_kernel(x_ref, w_ref, b_ref, o_ref):
    # x_ref: [TILE, 6]  row-major input block (batch on the sublane axis)
    # w_ref: [6, 1]     weight column (VMEM-resident across the whole grid)
    # b_ref: [1, 1]     bias         (VMEM-resident across the whole grid)
    # o_ref: [1, TILE]  lane-dense output block (dense, unmasked stores)
    x = x_ref[...].astype(jnp.float32)
    # K=6 contraction; compute cost is negligible next to the HBM stream.
    z = jax.lax.dot_general(
        x, w_ref[...],
        dimension_numbers=(((1,), (0,)), ((), ())),
        preferred_element_type=jnp.float32,
    )                                            # [TILE, 1]
    # Move the batch onto the 128-lane axis (small XLU relayout; slot is idle)
    # so the store below is a dense vst stream instead of 1-of-128 masked stores.
    z = z.T + b_ref[...]                         # [1, TILE]
    # sigmoid(z) = 1 / (1 + exp(-z)); exp lands on the EUP.
    y = pl.reciprocal(1.0 + jnp.exp(-z), approx=False)
    o_ref[...] = y.astype(o_ref.dtype)


def titanic_slp_forward(x, params, *, tile=_MAX_TILE, min_pallas_batch=8192,
                        force_pallas=False):
    """Forward pass of TitanicSLP.  x: [B, 6] float.  Returns [B, 1] float32."""
    B, F = x.shape
    assert F == 6, f"expected 6 features, got {F}"
    w = params["w"].astype(jnp.float32).reshape(6, 1)
    b = params["b"].astype(jnp.float32).reshape(1, 1)

    # Small batches: fixed pallas_call / reshape costs dwarf the < 1 MB of work.
    if B < min_pallas_batch and not force_pallas:
        return jax.nn.sigmoid(x.astype(jnp.float32) @ w + b)

    # --- batch-tile selection --------------------------------------------
    tile = _round_up(max(min(int(tile), _MAX_TILE), _LANE), _LANE)
    if B >= 2 * _LANE:
        # Guarantee >= 2 grid steps so ("parallel",) splits work across both
        # v7x TensorCores, and never ask for a tile (much) bigger than B.
        tile = min(tile, _round_up(pl.cdiv(B, 2), _LANE))
    else:
        tile = _LANE
    grid = pl.cdiv(B, tile)            # ragged final block handled by Pallas

    # [TILE, 6] f32 blocks pad the 6-wide minor dim to 128 lanes in VMEM
    # (512 B/row), double-buffered, plus the [1, TILE] output double buffer.
    vmem_bytes = 2 * tile * 512 + 2 * tile * 4 + (2 << 20)

    out = pl.pallas_call(
        _slp_kernel,
        out_shape=jax.ShapeDtypeStruct((1, B), jnp.float32),
        grid=(grid,),
        in_specs=[
            pl.BlockSpec((tile, 6), lambda i: (i, 0)),   # batch-tiled input
            pl.BlockSpec((6, 1), lambda i: (0, 0)),      # weight, stays resident
            pl.BlockSpec((1, 1), lambda i: (0, 0)),      # bias,   stays resident
        ],
        out_specs=pl.BlockSpec((1, tile), lambda i: (0, i)),
        compiler_params=pltpu.CompilerParams(
            dimension_semantics=("parallel",),
            vmem_limit_bytes=max(vmem_bytes, 32 * 1024 * 1024),
        ),
        cost_estimate=pl.CostEstimate(
            flops=13 * B,                       # 6 mul + 6 add + bias add per row
            transcendentals=B,                  # sigmoid
            bytes_accessed=(6 * 4 + 4) * B + 6 * 4 + 4,
        ),
    )(x, w, b)

    return out.reshape(B, 1)


def init_params(key):
    """Matches PyTorch nn.Linear(6, 1) default init; weight kept as a [6, 1] column."""
    kw, kb = jax.random.split(key)
    bound = 1.0 / jnp.sqrt(6.0)
    w = jax.random.uniform(kw, (6, 1), jnp.float32, -bound, bound)
    b = jax.random.uniform(kb, (1, 1), jnp.float32, -bound, bound)
    return {"w": w, "b": b}


def reference_forward(x, p):
    return jax.nn.sigmoid(x.astype(jnp.float32) @ p["w"].reshape(6, 1)
                          + p["b"].reshape(1, 1))


if __name__ == "__main__":
    key = jax.random.PRNGKey(0)
    kp, kx1, kx2 = jax.random.split(key, 3)
    params = init_params(kp)

    # Small batch consistent with the module (Titanic feature width = 6);
    # force the Pallas path so the kernel itself is exercised.
    B1 = 8
    x1 = jax.random.normal(kx1, (B1, 6), jnp.float32)
    out1 = jax.block_until_ready(titanic_slp_forward(x1, params, force_pallas=True))
    ref1 = reference_forward(x1, params)
    assert out1.shape == (B1, 1), out1.shape
    assert jnp.allclose(out1, ref1, atol=1e-5, rtol=1e-5), "mismatch vs reference (B=8)"

    # Non-aligned batch with a small tile override: exercises the multi-step
    # "parallel" grid and the ragged (masked) final block.
    B2 = 300
    x2 = jax.random.normal(kx2, (B2, 6), jnp.float32)
    out2 = jax.block_until_ready(
        titanic_slp_forward(x2, params, tile=128, force_pallas=True))
    ref2 = reference_forward(x2, params)
    assert out2.shape == (B2, 1), out2.shape
    assert jnp.allclose(out2, ref2, atol=1e-5, rtol=1e-5), "mismatch vs reference (B=300)"

    # Small-batch fallback path (plain XLA) sanity check.
    out3 = jax.block_until_ready(titanic_slp_forward(x2, params))
    assert jnp.allclose(out3, ref2, atol=1e-5, rtol=1e-5), "mismatch vs reference (fallback)"

    print("KERNEL_OK")
</pallas_src>

<mosaic_0001>
module attributes {stable_mosaic.version = 11 : i64} {
  func.func @_slp_kernel(%arg0: i32, %arg1: memref<128x6xf32, #tpu.memory_space<vmem>>, %arg2: memref<6x1xf32, #tpu.memory_space<vmem>>, %arg3: memref<1x1xf32, #tpu.memory_space<vmem>>, %arg4: memref<1x128xf32, #tpu.memory_space<vmem>>) attributes {dimension_semantics = [#tpu.dimension_semantics<parallel>], iteration_bounds = array<i64: 1>, scalar_prefetch = 0 : i64, scratch_operands = 0 : i64, tpu.core_type = #tpu.core_type<tc>, window_params = [{transform_indices = @transform_0, window_bounds = array<i64: 128, 6>}, {pipeline_mode = #tpu.pipeline_mode<synchronous>, transform_indices = @transform_1, window_bounds = array<i64: 6, 1>}, {pipeline_mode = #tpu.pipeline_mode<synchronous>, transform_indices = @transform_2, window_bounds = array<i64: 1, 1>}, {transform_indices = @transform_3, window_bounds = array<i64: 1, 128>}]} {
    %c0 = arith.constant 0 : index
    %c0_0 = arith.constant 0 : index
    %0 = vector.load %arg1[%c0, %c0_0] : memref<128x6xf32, #tpu.memory_space<vmem>>, vector<128x6xf32>
    %c0_1 = arith.constant 0 : index
    %c0_2 = arith.constant 0 : index
    %1 = vector.load %arg2[%c0_1, %c0_2] : memref<6x1xf32, #tpu.memory_space<vmem>>, vector<6x1xf32>
    %cst = arith.constant dense<0.000000e+00> : vector<128x1xf32>
    %2 = tpu.matmul %0, %1, %cst {dimension_numbers = #tpu.dot_dimension_numbers<[1], [0], [0], [1], [0, 0, 1, 1], [], []>} : vector<128x6xf32>, vector<6x1xf32>, vector<128x1xf32> -> vector<128x1xf32>
    %3 = tpu.transpose %2, [1, 0] : vector<128x1xf32> -> vector<1x128xf32>
    %c0_3 = arith.constant 0 : index
    %c0_4 = arith.constant 0 : index
    %4 = vector.load %arg3[%c0_3, %c0_4] : memref<1x1xf32, #tpu.memory_space<vmem>>, vector<1x1xf32>
    %5 = vector.broadcast %4 : vector<1x1xf32> to vector<1x128xf32>
    %6 = arith.addf %3, %5 : vector<1x128xf32>
    %cst_5 = arith.constant 0.000000e+00 : f32
    %7 = vector.broadcast %cst_5 : f32 to vector<1x128xf32>
    %8 = arith.subf %7, %6 : vector<1x128xf32>
    %9 = math.exp %8 : vector<1x128xf32>
    %cst_6 = arith.constant 1.000000e+00 : f32
    %10 = vector.broadcast %cst_6 : f32 to vector<1x128xf32>
    %11 = arith.addf %10, %9 : vector<1x128xf32>
    %12 = tpu.reciprocal %11 : vector<1x128xf32> -> vector<1x128xf32>
    %c0_7 = arith.constant 0 : index
    %c0_8 = arith.constant 0 : index
    %13 = vector.load %arg4[%c0_7, %c0_8] : memref<1x128xf32, #tpu.memory_space<vmem>>, vector<1x128xf32>
    tpu.vector_store %arg4[%c0_7, %c0_8], %12 {strides = array<i32>} : memref<1x128xf32, #tpu.memory_space<vmem>>, vector<1x128xf32>,
    return
  }
  func.func @transform_0(%arg0: i32) -> (i32, i32) {
    %c0_i32 = arith.constant 0 : i32
    %c0_i32_0 = arith.constant 0 : i32
    return %arg0, %c0_i32 : i32, i32
  }
  func.func @transform_1(%arg0: i32) -> (i32, i32) {
    %c0_i32 = arith.constant 0 : i32
    %c0_i32_0 = arith.constant 0 : i32
    %c0_i32_1 = arith.constant 0 : i32
    return %c0_i32, %c0_i32_0 : i32, i32
  }
  func.func @transform_2(%arg0: i32) -> (i32, i32) {
    %c0_i32 = arith.constant 0 : i32
    %c0_i32_0 = arith.constant 0 : i32
    %c0_i32_1 = arith.constant 0 : i32
    return %c0_i32, %c0_i32_0 : i32, i32
  }
  func.func @transform_3(%arg0: i32) -> (i32, i32) {
    %c0_i32 = arith.constant 0 : i32
    %c0_i32_0 = arith.constant 0 : i32
    return %c0_i32, %arg0 : i32, i32
  }
}

</mosaic_0001>

<bundles_post_ra>
// kernel: tpu_custom_call.1
= control target key start
LH: loop header
LB: loop body
LE: loop exit
PB: predicated region body
PF: predicated region fallthrough
CT: control target
= control target key end

     0   :  { %s481_s0 = inlined_call_operand.vmem [shape: f32[8,6], index: 0, kind: input, shape index: {}]   ;;  %s482_s1 = inlined_call_operand.vmem [shape: f32[6,1], index: 1, kind: input, shape index: {}]   ;;  %s483_s2 = inlined_call_operand.<no memory space> [shape: f32[1,1], index: 2, kind: input, shape index: {}]   ;;  %s484_s3 = inlined_call_operand.hbm [shape: f32[1,8], index: 3, kind: output, shape index: {}]  }
   0x1   :  { %v8_v0 = vstv %s483_s2 }
   0x2   :  { %9 = vst [vmem:[#allocation2] sm:$0x1] %v8_v0 }
   0x3   :  { %v33_v1 = vld [vmem:[%s482_s1] sm:$0x3f]  ;;  %vm83_vm0 = vcmask 1045504   ;;  %vm34_vm1 = vcmask 48128   ;;  %v18_v3 = vld [vmem:[%s481_s0 + $0x8] sm:$0xff]  ;;  %v19_v4 = vld [vmem:[%s481_s0 + $0x10] sm:$0xff] }
   0x4   :  { %v17_v2 = vld [vmem:[%s481_s0] sm:$0xff]  ;;  %329 = vmatprep.subr.msk.mxu0 %vm83_vm0, %v33_v1  ;;  %355 = vmatprep.subr.msk.mxu1 %vm83_vm0, %v33_v1  ;;  %v26_v6 = vld [vmem:[%s481_s0 + $0x48] sm:$0xff]  ;;  %v27_v7 = vld [vmem:[%s481_s0 + $0x50] sm:$0xff]  ;;  %v386_v10 = vmov 0  }
   0x5   :  { %331 = vmatprep.mubr.msk.f32.mxu0 %vm34_vm1, %v17_v2  ;;  %330 = vmatpush3.msk.msra.mxu0 %vm83_vm0, %v33_v1  ;;  %v25_v5 = vld [vmem:[%s481_s0 + $0x40] sm:$0xff]  ;;  %v20_v8 = vld [vmem:[%s481_s0 + $0x18] sm:$0xff] }
   0x6   :  { %332 = vmatmul.mubr.msk.f32.vlgmr.msra.gmra.mxu0 %vm34_vm1, %v18_v3  ;;  %356 = vmatpush3.msk.msra.mxu1 %vm83_vm0, %v33_v1  ;;  %v21_v9 = vld [vmem:[%s481_s0 + $0x20] sm:$0xff]  ;;  %v28_v12 = vld [vmem:[%s481_s0 + $0x58] sm:$0xff] }
   0x7   :  { %334 = vmatprep.mubr.msk.f32.mxu0 %vm34_vm1, %v19_v4  ;;  %343 = vmatprep.mubr.msk.f32.mxu1 %vm34_vm1, %v25_v5 }
   0x8   :  { %344 = vmatmul.mubr.msk.f32.vlgmr.msra.gmra.mxu1 %vm34_vm1, %v26_v6  ;;  %359 = vset.pattern.permute.xlu0 %v386_v10 }
   0x9   :  { %v264_v11 = vld [vmem:[#allocation2] sm:$0x1]  ;;  %346 = vmatprep.mubr.msk.f32.mxu1 %vm34_vm1, %v27_v7 }
   0xa   :  { %267 = vperm.xlu0 %359, %v264_v11  }
   0xb   :  { %10 = vsyncpa [#allocation4], 0  ;;  %335 = vmatmul.mubr.msk.f32.gmra.mxu0 %vm34_vm1, %v20_v8  ;;  %v29_v13 = vld [vmem:[%s481_s0 + $0x60] sm:$0xff]  ;;  %v22_v14 = vld [vmem:[%s481_s0 + $0x28] sm:$0xff]  ;;  %v270_v36 = vlaneseq }
   0xc   :  { %337 = vmatprep.mubr.msk.f32.mxu0 %vm34_vm1, %v21_v9  ;;  %v23_v15 = vld [vmem:[%s481_s0 + $0x30] sm:$0xff]  ;;  %347 = vmatmul.mubr.msk.f32.gmra.mxu1 %vm34_vm1, %v28_v12  ;;  %v30_v16 = vld [vmem:[%s481_s0 + $0x68] sm:$0xff]  ;;  %v24_v18 = vld [vmem:[%s481_s0 + $0x38] sm:$0xff] }
   0xd   :  { %349 = vmatprep.mubr.msk.f32.mxu1 %vm34_vm1, %v29_v13  ;;  %v31_v17 = vld [vmem:[%s481_s0 + $0x70] sm:$0xff]  ;;  %v32_v19 = vld [vmem:[%s481_s0 + $0x78] sm:$0xff]  ;;  %v271_v37 = vshrl.u32 %v270_v36, 7  ;;  %s387_s0 = smov [#allocation3]  }
   0xe   :  { %s287_s19 = sshll.u32 %s387_s0, 4  ;;  %s288_s19 = int_to_ptr.vmem [resolvable:$true] %s287_s19 }
   0xf   :  { %338 = vmatmul.mubr.msk.f32.gmra.mxu0 %vm34_vm1, %v22_v14  ;;  %v272_v38 = vsub.s32 0, %v271_v37  ;;  %s364_s20 = scalar_lea.vmem %s288_s19, 16  ;;  %s368_s2 = scalar_lea.vmem %s288_s19, 32 }
  0x10   :  { %340 = vmatprep.mubr.msk.f32.mxu0 %vm34_vm1, %v23_v15  ;;  %350 = vmatmul.mubr.msk.f32.gmra.mxu1 %vm34_vm1, %v30_v16  ;;  %p365_p0 = scmp.ne.s32.totalorder %s288_s19, %s364_s20  ;;  %p369_p1 = scmp.lt.s32.totalorder %s288_s19, %s288_s19 }
  0x11   :  { %352 = vmatprep.mubr.msk.f32.mxu1 %vm34_vm1, %v31_v17  ;;  %p370_p2 = scmp.lt.s32.totalorder %s368_s2, %s364_s20 }
  0x13   :  { %341 = vmatmul.mubr.msk.f32.gmra.mxu0 %vm34_vm1, %v24_v18  ;;  %p371_p3 = por %p370_p2, %p369_p1 }
  0x14   :  { %353 = vmatmul.mubr.msk.f32.gmra.mxu1 %vm34_vm1, %v32_v19 }
  0x15   :  { %p372_p4 = pnand %p371_p3, %p365_p0 }
  0x85   :  { %v268_v39 = vpop.permute.xlu0 %267 }
  0x86   :  { %v273_v40 = vrot.slane %v268_v39, %v272_v38 }
  0xc6   :  { %v333_v20 = vpop.f32.mrf.mxu0 }
  0xc8   :  { %v153_v21 = vpop.f32.mrf.mxu0  ;;  %v345_v28 = vpop.f32.mrf.mxu1 }
  0xc9   :  { %232 = vxpose.xlu0.b32.start [1/16] (narrow) %v153_v21, 8 }
  0xca   :  { %v193_v29 = vpop.f32.mrf.mxu1 }
  0xcb   :  { %v336_v22 = vpop.f32.mrf.mxu0 }
  0xcc   :  { %v348_v30 = vpop.f32.mrf.mxu1 }
  0xcd   :  { %233 = vxpose.xlu0.b32.cont [2/16] (narrow) %v333_v20, 8  ;;  %v163_v23 = vpop.f32.mrf.mxu0 }
  0xce   :  { %v203_v31 = vpop.f32.mrf.mxu1 }
  0xcf   :  { %v339_v24 = vpop.f32.mrf.mxu0 }
  0xd0   :  { %v351_v32 = vpop.f32.mrf.mxu1 }
  0xd1   :  { %234 = vxpose.xlu0.b32.cont [3/16] (narrow) %v163_v23, 8  ;;  %v173_v25 = vpop.f32.mrf.mxu0 }
  0xd2   :  { %v213_v33 = vpop.f32.mrf.mxu1 }
  0xd3   :  { %v342_v26 = vpop.f32.mrf.mxu0 }
  0xd4   :  { %v354_v34 = vpop.f32.mrf.mxu1 }
  0xd5   :  { %235 = vxpose.xlu0.b32.cont [4/16] (narrow) %v336_v22, 8  ;;  %v183_v27 = vpop.f32.mrf.mxu0 }
  0xd6   :  { %v223_v35 = vpop.f32.mrf.mxu1 }
  0xd9   :  { %236 = vxpose.xlu0.b32.cont [5/16] (narrow) %v173_v25, 8 }
  0xdd   :  { %237 = vxpose.xlu0.b32.cont [6/16] (narrow) %v339_v24, 8 }
  0xe1   :  { %238 = vxpose.xlu0.b32.cont [7/16] (narrow) %v183_v27, 8 }
  0xe5   :  { %239 = vxpose.xlu0.b32.cont [8/16] (narrow) %v342_v26, 8 }
  0xe9   :  { %240 = vxpose.xlu0.b32.cont [9/16] (narrow) %v193_v29, 8 }
  0xed   :  { %241 = vxpose.xlu0.b32.cont [10/16] (narrow) %v345_v28, 8 }
  0xf1   :  { %242 = vxpose.xlu0.b32.cont [11/16] (narrow) %v203_v31, 8 }
  0xf5   :  { %243 = vxpose.xlu0.b32.cont [12/16] (narrow) %v348_v30, 8 }
  0xf9   :  { %244 = vxpose.xlu0.b32.cont [13/16] (narrow) %v213_v33, 8 }
  0xfd   :  { %245 = vxpose.xlu0.b32.cont [14/16] (narrow) %v351_v32, 8 }
 0x101   :  { %246 = vxpose.xlu0.b32.cont [15/16] (narrow) %v223_v35, 8 }
 0x105   :  { %247 = vxpose.xlu0.b32.end [16/16] (narrow) %v354_v34, 8 }
 0x145   :  { %v248_v41 = vpop.trf.xlu0 }
 0x146   :  { %v274_v42 = vadd.f32 %v273_v40, %v248_v41 }
 0x148   :  { %v275_v43 = vsub.f32 0.0, %v274_v42 }
 0x14a   :  { %v276_v44 = vmul.f32 1.442695, %v275_v43 }
 0x14c   :  { %360 = vpow2.f32 %v276_v44 }
 0x159   :  { %v361_v45 = vpop.eup %360 }
 0x15a   :  { %v278_v46 = vadd.f32 1.0, %v361_v45 }
 0x15c   :  { %362 = vrcp.f32 %v278_v46 }
 0x169   :  { %v363_v47 = vpop.eup %362 }
 0x16a   :  { %280 = vst [vmem:[#allocation3] sm:$0x1] %v363_v47 }
 0x16b   :  { %375 = shalt.err (!%p372_p4)
}
 0x16c   :  { %290 = dma.vmem_to_hbm [thread:$0]  %s288_s19, 16, %s484_s3, [#allocation4]  }
 0x16d   :  { %384 = dma.done.wait [#allocation4], 16  }
 0x16e   :  { %385 = vsyncadd [#allocation4], 4294967280 }
 0x16f   :  { %294 = vsyncpa [#allocation4], 1 }

</bundles_post_ra>
